<compile_context>
chip_gen: v6e
topology: v6e:2x2x1
jax: 0.10.0
libtpu: 0.0.40
codegen_flags: <defaults>
</compile_context>

<pallas_src>
import functools
import math

import jax
import jax.numpy as jnp
from jax.experimental import pallas as pl
from jax.experimental.pallas import tpu as pltpu

EPS = 1e-5
_LANES = 128


# ----------------------------------------------------------------------------
# Generation-aware budgets (VMEM limit, fused-staging cap, tile size, #TCs).
# ----------------------------------------------------------------------------
@functools.lru_cache(maxsize=None)
def _tpu_config():
    kind = ""
    try:
        kind = jax.devices()[0].device_kind.lower()
    except Exception:
        pass
    is_v7 = ("v7" in kind) or ("tpu7" in kind)
    multi_tc = is_v7 or ("v4" in kind) or ("v5p" in kind)

    vmem_cap = None
    try:
        info = pltpu.get_tpu_info()
        vmem_cap = int(getattr(info, "vmem_capacity_bytes", 0)) or None
    except Exception:
        vmem_cap = None
    if vmem_cap is None:
        vmem_cap = (64 if is_v7 else 128) * 1024 * 1024

    if vmem_cap >= 100 * 1024 * 1024:
        # 128 MiB VMEM parts (v5e / v6e / v5p / v4): use VMEM aggressively.
        return dict(vmem_limit=80 << 20, fused_max=28 << 20, tile_target=6 << 20,
                    num_tc=2 if multi_tc else 1, extra_buf=is_v7)
    # 64 MiB parts (v7x) or unknown: conservative budgets.
    return dict(vmem_limit=44 << 20, fused_max=14 << 20, tile_target=3 << 20,
                num_tc=2 if multi_tc else 1, extra_buf=is_v7)


def _x_block_spec(shape, index_map, extra_buffers):
    """BlockSpec with optional 3-deep pipelining (v7x); falls back if unsupported."""
    if extra_buffers:
        try:
            return pl.BlockSpec(shape, index_map, pipeline_mode=pl.Buffered(3))
        except Exception:
            pass
    return pl.BlockSpec(shape, index_map)


# ----------------------------------------------------------------------------
# Fused single-HBM-read kernel: two-phase grid (stats+stage, then apply).
# ----------------------------------------------------------------------------
def _fused_kernel(gb_ref, x_ref, o_ref, xs_ref, acc_ref, ss_ref, *,
                  block_rows, valid_rows, nb, count, fold, chan, has_tail):
    phase = pl.program_id(0)
    j = pl.program_id(1)

    @pl.when(phase == 0)
    def _stats_phase():
        @pl.when(j == 0)
        def _init():
            acc_ref[...] = jnp.zeros_like(acc_ref)

        xin = x_ref[...]
        off = pl.multiple_of(j * block_rows, block_rows)
        xs_ref[pl.ds(off, block_rows), :] = xin            # stage for phase 1
        xf = xin.astype(jnp.float32)

        def accumulate(xv):
            acc_ref[0:1, :] += jnp.sum(xv, axis=0, keepdims=True)
            acc_ref[1:2, :] += jnp.sum(xv * xv, axis=0, keepdims=True)

        if has_tail:
            # Only the tail-owning block pays for the iota/compare/select mask.
            @pl.when(j == nb - 1)
            def _tail_block():
                rows_left = valid_rows - j * block_rows
                rid = jax.lax.broadcasted_iota(jnp.int32, xf.shape, 0)
                accumulate(jnp.where(rid < rows_left, xf, 0.0))

            @pl.when(j != nb - 1)
            def _full_block():
                accumulate(xf)
        else:
            accumulate(xf)

    @pl.when(phase == 1)
    def _apply_phase():
        @pl.when(j == 0)
        def _prep():
            s = acc_ref[0:1, :]
            sq = acc_ref[1:2, :]
            sh, f = chan, fold
            while f > 1:                    # log2(fold) XLU rotations
                s = s + pltpu.roll(s, shift=sh, axis=1)
                sq = sq + pltpu.roll(sq, shift=sh, axis=1)
                sh *= 2
                f //= 2
            inv_n = 1.0 / count
            mean = s * inv_n
            var = jnp.maximum(sq * inv_n - mean * mean, 0.0)   # clamp E[x^2]-m^2
            rstd = jax.lax.rsqrt(var + EPS)
            scale = gb_ref[0:1, :] * rstd
            shift = gb_ref[1:2, :] - mean * scale
            ss_ref[0:1, :] = scale
            ss_ref[1:2, :] = shift

        off = pl.multiple_of(j * block_rows, block_rows)
        xv = xs_ref[pl.ds(off, block_rows), :].astype(jnp.float32)
        o_ref[...] = (xv * ss_ref[0:1, :] + ss_ref[1:2, :]).astype(o_ref.dtype)


# ----------------------------------------------------------------------------
# Two-pass path, pass 1: per-lane sum / sum-of-squares into a VMEM scratch,
# optional 2-way split over row blocks (multi-TensorCore chips only).
# ----------------------------------------------------------------------------
def _stats_kernel(x_ref, out_ref, acc_ref, *, block_rows, valid_rows, nb,
                  nb_per, nsplit, has_tail):
    split = pl.program_id(0)
    j = pl.program_id(1)

    if nsplit > 1:
        # split 0 walks forward from block 0; split 1 walks backward from nb-1,
        # so the block index is always in range; ownership guard avoids double count.
        blk = split * (nb - 1) + (1 - 2 * split) * j
        owned = blk >= split * nb_per
    else:
        blk = j
        owned = None

    @pl.when(j == 0)
    def _init():
        acc_ref[...] = jnp.zeros_like(acc_ref)

    def body(masked):
        x = x_ref[...].astype(jnp.float32)
        if masked:
            rows_left = valid_rows - blk * block_rows
            rid = jax.lax.broadcasted_iota(jnp.int32, x.shape, 0)
            x = jnp.where(rid < rows_left, x, 0.0)
        acc_ref[0:1, :] += jnp.sum(x, axis=0, keepdims=True)
        acc_ref[1:2, :] += jnp.sum(x * x, axis=0, keepdims=True)

    def guard(cond):
        return cond if owned is None else jnp.logical_and(owned, cond)

    if has_tail:
        @pl.when(guard(blk == nb - 1))
        def _tail():
            body(True)

        @pl.when(guard(blk != nb - 1))
        def _full():
            body(False)
    else:
        if owned is None:
            body(False)
        else:
            @pl.when(owned)
            def _full():
                body(False)

    @pl.when(j == nb_per - 1)
    def _finish():
        out_ref[...] = acc_ref[...]        # single write-out per split


# ----------------------------------------------------------------------------
# Two-pass path, pass 2: per-channel scale/shift recomputed in-kernel (tiny,
# overlaps with the block DMA), then a broadcast FMA over the row block.
# ----------------------------------------------------------------------------
def _apply_kernel(stats_ref, gb_ref, x_ref, o_ref, *, count, fold, chan):
    st = jnp.sum(stats_ref[...], axis=0)      # (2, ceff): combine per-core partials
    s = st[0:1, :]
    sq = st[1:2, :]
    sh, f = chan, fold
    while f > 1:                              # combine lane replicas
        s = s + pltpu.roll(s, shift=sh, axis=1)
        sq = sq + pltpu.roll(sq, shift=sh, axis=1)
        sh *= 2
        f //= 2
    inv_n = 1.0 / count
    mean = s * inv_n
    var = jnp.maximum(sq * inv_n - mean * mean, 0.0)
    rstd = jax.lax.rsqrt(var + EPS)
    scale = gb_ref[0:1, :] * rstd
    shift = gb_ref[1:2, :] - mean * scale
    x = x_ref[...].astype(jnp.float32)
    o_ref[...] = (x * scale + shift).astype(o_ref.dtype)


# ----------------------------------------------------------------------------
# Wrapper.
# ----------------------------------------------------------------------------
def point_batch_norm(x, gamma, beta, *, block_rows=None, force_two_pass=False):
    """Forward pass of PointBatchNorm for x of shape [M, C] or [M, L, C]."""
    orig_shape = x.shape
    if x.ndim == 3:
        x2 = x.reshape(-1, x.shape[-1])
    elif x.ndim == 2:
        x2 = x
    else:
        raise NotImplementedError
    M, C = x2.shape
    itemsize = x2.dtype.itemsize
    cfg = _tpu_config()

    # ---- lane folding: pack `fold` consecutive rows into the 128-lane dim ----
    fold = _LANES // math.gcd(C, _LANES)
    if fold > 1 and M % fold == 0:
        meff, ceff = M // fold, C * fold
        xw = x2.reshape(meff, ceff)            # row-major: channel = lane % C
    else:
        fold, meff, ceff, xw = 1, M, C, x2

    gamma_l = jnp.tile(gamma.astype(jnp.float32).reshape(C), fold).reshape(1, ceff)
    beta_l = jnp.tile(beta.astype(jnp.float32).reshape(C), fold).reshape(1, ceff)
    gb = jnp.concatenate([gamma_l, beta_l], axis=0)        # (2, ceff)

    # ---- row-block sizing: dtype-aware sublane multiple, generation-aware bytes ----
    sub = max(8, 32 // itemsize)               # 8 f32, 16 bf16, 32 int8/fp8
    target_rows = block_rows if block_rows is not None else max(
        sub, cfg["tile_target"] // (ceff * itemsize))
    if meff <= sub:
        br = meff
    else:
        br = max(sub, (min(target_rows, meff) // sub) * sub)
    nb = pl.cdiv(meff, br)
    has_tail = (meff % br) != 0
    padded_rows = nb * br

    vmem_limit = cfg["vmem_limit"]
    blk_bytes = br * ceff * itemsize
    staged_bytes = padded_rows * ceff * itemsize
    fused_fits = (staged_bytes <= cfg["fused_max"] and
                  staged_bytes + 4 * blk_bytes + 2 * br * ceff * 4 + (2 << 20) <= vmem_limit)
    count = float(M)

    if fused_fits and not force_two_pass:
        # ---------- fused single-HBM-read path: two-phase pipelined grid ----------
        yw = pl.pallas_call(
            functools.partial(_fused_kernel, block_rows=br, valid_rows=meff, nb=nb,
                              count=count, fold=fold, chan=C, has_tail=has_tail),
            out_shape=jax.ShapeDtypeStruct((meff, ceff), x2.dtype),
            grid=(2, nb),
            in_specs=[
                pl.BlockSpec((2, ceff), lambda p, j: (0, 0)),
                # phase 0 streams blocks; phase 1 parks on block 0 (no re-read).
                pl.BlockSpec((br, ceff), lambda p, j: ((1 - p) * j, 0)),
            ],
            # phase 0 parks on block 0 (never written back mid-phase); phase 1 streams out.
            out_specs=pl.BlockSpec((br, ceff), lambda p, j: (p * j, 0)),
            scratch_shapes=[
                pltpu.VMEM((padded_rows, ceff), x2.dtype),   # staged copy of x
                pltpu.VMEM((2, ceff), jnp.float32),          # sum / sumsq
                pltpu.VMEM((2, ceff), jnp.float32),          # scale / shift
            ],
            compiler_params=pltpu.CompilerParams(
                dimension_semantics=("arbitrary", "arbitrary"),
                vmem_limit_bytes=vmem_limit),
            cost_estimate=pl.CostEstimate(
                flops=5 * M * C, transcendentals=C,
                bytes_accessed=2 * M * C * itemsize),
        )(gb, xw)
    else:
        # ---------- tiled two-pass path ----------
        nsplit = cfg["num_tc"] if nb >= 2 * cfg["num_tc"] else 1
        nb_per = pl.cdiv(nb, nsplit)

        if nsplit > 1:
            x_idx = lambda s, j: (s * (nb - 1) + (1 - 2 * s) * j, 0)
        else:
            x_idx = lambda s, j: (j, 0)

        partial_stats = pl.pallas_call(
            functools.partial(_stats_kernel, block_rows=br, valid_rows=meff, nb=nb,
                              nb_per=nb_per, nsplit=nsplit, has_tail=has_tail),
            out_shape=jax.ShapeDtypeStruct((nsplit, 2, ceff), jnp.float32),
            grid=(nsplit, nb_per),
            in_specs=[pl.BlockSpec((br, ceff), x_idx)],
            out_specs=pl.BlockSpec((None, 2, ceff), lambda s, j: (s, 0, 0)),
            scratch_shapes=[pltpu.VMEM((2, ceff), jnp.float32)],
            compiler_params=pltpu.CompilerParams(
                dimension_semantics=("parallel", "arbitrary"),
                vmem_limit_bytes=vmem_limit),
            cost_estimate=pl.CostEstimate(
                flops=3 * M * C, transcendentals=0,
                bytes_accessed=M * C * itemsize),
        )(xw)

        yw = pl.pallas_call(
            functools.partial(_apply_kernel, count=count, fold=fold, chan=C),
            out_shape=jax.ShapeDtypeStruct((meff, ceff), x2.dtype),
            grid=(nb,),
            in_specs=[
                pl.BlockSpec((nsplit, 2, ceff), lambda i: (0, 0, 0)),
                pl.BlockSpec((2, ceff), lambda i: (0, 0)),
                _x_block_spec((br, ceff), lambda i: (i, 0), cfg["extra_buf"]),
            ],
            out_specs=pl.BlockSpec((br, ceff), lambda i: (i, 0)),
            compiler_params=pltpu.CompilerParams(
                dimension_semantics=("parallel",),
                vmem_limit_bytes=vmem_limit),
            cost_estimate=pl.CostEstimate(
                flops=2 * M * C, transcendentals=C,
                bytes_accessed=2 * M * C * itemsize),
        )(partial_stats, gb, xw)

    y = yw if fold == 1 else yw.reshape(M, C)
    return y.reshape(orig_shape)


def _reference(x, gamma, beta):
    """Pure-JAX reference matching BatchNorm1d training-mode semantics."""
    orig_shape = x.shape
    x2 = x.reshape(-1, x.shape[-1]).astype(jnp.float32)
    mean = jnp.mean(x2, axis=0, keepdims=True)
    var = jnp.mean(x2 * x2, axis=0, keepdims=True) - mean * mean
    y = (x2 - mean) * jax.lax.rsqrt(var + EPS) * gamma[None, :].astype(jnp.float32) \
        + beta[None, :].astype(jnp.float32)
    return y.reshape(orig_shape)


if __name__ == "__main__":
    key = jax.random.PRNGKey(0)
    k1, k2, k3, k4, k5, k6 = jax.random.split(key, 6)

    C = 32          # embed_channels
    BN = 48         # B*N points (2D case)
    L = 8           # neighborhood size (3D case)

    # Deterministic "parameters" of nn.BatchNorm1d(C): weight (gamma), bias (beta).
    gamma = 1.0 + 0.1 * jax.random.normal(k3, (C,), dtype=jnp.float32)
    beta = 0.1 * jax.random.normal(k4, (C,), dtype=jnp.float32)

    # 2D input [B*N, C]  -> fused, lane-folded path.
    x2d = jax.random.normal(k1, (BN, C), dtype=jnp.float32)
    y2d = jax.block_until_ready(point_batch_norm(x2d, gamma, beta))
    assert y2d.shape == x2d.shape
    assert jnp.allclose(y2d, _reference(x2d, gamma, beta), atol=1e-4, rtol=1e-4)

    # 3D input [B*N, L, C] -> fused, lane-folded path.
    x3d = jax.random.normal(k2, (BN, L, C), dtype=jnp.float32)
    y3d = jax.block_until_ready(point_batch_norm(x3d, gamma, beta))
    assert y3d.shape == x3d.shape
    assert jnp.allclose(y3d, _reference(x3d, gamma, beta), atol=1e-4, rtol=1e-4)

    # Tiled two-pass path (forced), lane-folded, ragged tail (+ core split on multi-TC).
    xt = jax.random.normal(k5, (1000, C), dtype=jnp.float32)
    yt = jax.block_until_ready(
        point_batch_norm(xt, gamma, beta, force_two_pass=True, block_rows=56))
    assert jnp.allclose(yt, _reference(xt, gamma, beta), atol=1e-4, rtol=1e-4)

    # Fallback: C=40 does not divide 128 (fold=16 skipped because 123 % 16 != 0).
    C2 = 40
    g2 = 1.0 + 0.1 * jax.random.normal(k6, (C2,), dtype=jnp.float32)
    b2 = 0.05 * jax.random.normal(k6, (C2,), dtype=jnp.float32)
    xo = jax.random.normal(k1, (123, C2), dtype=jnp.float32)
    yo_fused = jax.block_until_ready(point_batch_norm(xo, g2, b2))
    yo_tiled = jax.block_until_ready(
        point_batch_norm(xo, g2, b2, force_two_pass=True, block_rows=16))
    assert jnp.allclose(yo_fused, _reference(xo, g2, b2), atol=1e-4, rtol=1e-4)
    assert jnp.allclose(yo_tiled, _reference(xo, g2, b2), atol=1e-4, rtol=1e-4)

    # bf16 input: exercises the 16-row sublane multiple and itemsize-aware tiling.
    xb = jax.random.normal(k2, (256, C), dtype=jnp.bfloat16)
    yb = jax.block_until_ready(point_batch_norm(xb, gamma, beta))
    assert yb.dtype == jnp.bfloat16
    assert jnp.allclose(yb.astype(jnp.float32), _reference(xb, gamma, beta),
                        atol=6e-2, rtol=6e-2)

    print("KERNEL_OK")
</pallas_src>

<mosaic_0001>
module attributes {stable_mosaic.version = 11 : i64} {
  func.func @_fused_kernel(%arg0: i32, %arg1: i32, %arg2: memref<2x128xf32, #tpu.memory_space<vmem>>, %arg3: memref<8x128xf32, #tpu.memory_space<vmem>>, %arg4: memref<8x128xf32, #tpu.memory_space<vmem>>, %arg5: memref<16x128xf32, #tpu.memory_space<vmem>>, %arg6: memref<2x128xf32, #tpu.memory_space<vmem>>, %arg7: memref<2x128xf32, #tpu.memory_space<vmem>>) attributes {dimension_semantics = [#tpu.dimension_semantics<arbitrary>, #tpu.dimension_semantics<arbitrary>], iteration_bounds = array<i64: 2, 2>, scalar_prefetch = 0 : i64, scratch_operands = 3 : i64, tpu.core_type = #tpu.core_type<tc>, window_params = [{pipeline_mode = #tpu.pipeline_mode<synchronous>, transform_indices = @transform_0, window_bounds = array<i64: 2, 128>}, {transform_indices = @transform_1, window_bounds = array<i64: 8, 128>}, {transform_indices = @transform_2, window_bounds = array<i64: 8, 128>}]} {
    %c0_i32 = arith.constant 0 : i32
    %0 = arith.cmpi eq, %arg0, %c0_i32 : i32
    %1 = arith.extui %0 : i1 to i32
    %c0_i32_0 = arith.constant 0 : i32
    %2 = arith.cmpi ne, %1, %c0_i32_0 : i32
    scf.if %2 {
      %c0_i32_2 = arith.constant 0 : i32
      %6 = arith.cmpi eq, %arg1, %c0_i32_2 : i32
      %7 = arith.extui %6 : i1 to i32
      %c0_i32_3 = arith.constant 0 : i32
      %8 = arith.cmpi ne, %7, %c0_i32_3 : i32
      scf.if %8 {
        %cst = arith.constant 0.000000e+00 : f32
        %20 = vector.broadcast %cst : f32 to vector<2x128xf32>
        %c0_10 = arith.constant 0 : index
        %c0_11 = arith.constant 0 : index
        %21 = vector.load %arg6[%c0_10, %c0_11] : memref<2x128xf32, #tpu.memory_space<vmem>>, vector<2x128xf32>
        tpu.vector_store %arg6[%c0_10, %c0_11], %20 {strides = array<i32>} : memref<2x128xf32, #tpu.memory_space<vmem>>, vector<2x128xf32>,
      } else {
      }
      %c0 = arith.constant 0 : index
      %c0_4 = arith.constant 0 : index
      %9 = vector.load %arg3[%c0, %c0_4] : memref<8x128xf32, #tpu.memory_space<vmem>>, vector<8x128xf32>
      %c8_i32 = arith.constant 8 : i32
      %10 = arith.muli %arg1, %c8_i32 : i32
      %11 = tpu.assume_multiple %10, 8 : i32
      %12 = arith.index_cast %11 : i32 to index
      %c0_5 = arith.constant 0 : index
      %13 = vector.load %arg5[%12, %c0_5] : memref<16x128xf32, #tpu.memory_space<vmem>>, vector<8x128xf32>
      tpu.vector_store %arg5[%12, %c0_5], %9 {strides = array<i32>} : memref<16x128xf32, #tpu.memory_space<vmem>>, vector<8x128xf32>,
      %c1_i32_6 = arith.constant 1 : i32
      %14 = arith.cmpi eq, %arg1, %c1_i32_6 : i32
      %15 = arith.extui %14 : i1 to i32
      %c0_i32_7 = arith.constant 0 : i32
      %16 = arith.cmpi ne, %15, %c0_i32_7 : i32
      scf.if %16 {
        %c8_i32_10 = arith.constant 8 : i32
        %20 = arith.muli %arg1, %c8_i32_10 : i32
        %c12_i32 = arith.constant 12 : i32
        %21 = arith.subi %c12_i32, %20 : i32
        %22 = tpu.iota {dimensions = array<i32: 0>} : vector<8x128xi32>
        %23 = vector.broadcast %21 : i32 to vector<8x128xi32>
        %24 = arith.cmpi slt, %22, %23 : vector<8x128xi32>
        %cst = arith.constant 0.000000e+00 : f32
        %25 = vector.broadcast %cst : f32 to vector<8x128xf32>
        %26 = arith.select %24, %9, %25 : vector<8x128xi1>, vector<8x128xf32>
        %c0_11 = arith.constant 0 : index
        %c0_12 = arith.constant 0 : index
        %27 = vector.load %arg6[%c0_11, %c0_12] : memref<2x128xf32, #tpu.memory_space<vmem>>, vector<1x128xf32>
        %cst_13 = arith.constant dense<0.000000e+00> : vector<128xf32>
        %28 = vector.multi_reduction <add>, %26, %cst_13 [0] : vector<8x128xf32> to vector<128xf32>
        %29 = vector.shape_cast %28 : vector<128xf32> to vector<1x128xf32>
        %30 = arith.addf %27, %29 : vector<1x128xf32>
        %c0_14 = arith.constant 0 : index
        %c0_15 = arith.constant 0 : index
        %31 = vector.load %arg6[%c0_14, %c0_15] : memref<2x128xf32, #tpu.memory_space<vmem>>, vector<1x128xf32>
        tpu.vector_store %arg6[%c0_14, %c0_15], %30 {strides = array<i32>} : memref<2x128xf32, #tpu.memory_space<vmem>>, vector<1x128xf32>,
        %c1 = arith.constant 1 : index
        %c0_16 = arith.constant 0 : index
        %32 = vector.load %arg6[%c1, %c0_16] : memref<2x128xf32, #tpu.memory_space<vmem>>, vector<1x128xf32>
        %33 = arith.mulf %26, %26 : vector<8x128xf32>
        %cst_17 = arith.constant dense<0.000000e+00> : vector<128xf32>
        %34 = vector.multi_reduction <add>, %33, %cst_17 [0] : vector<8x128xf32> to vector<128xf32>
        %35 = vector.shape_cast %34 : vector<128xf32> to vector<1x128xf32>
        %36 = arith.addf %32, %35 : vector<1x128xf32>
        %c1_18 = arith.constant 1 : index
        %c0_19 = arith.constant 0 : index
        %37 = vector.load %arg6[%c1_18, %c0_19] : memref<2x128xf32, #tpu.memory_space<vmem>>, vector<1x128xf32>
        tpu.vector_store %arg6[%c1_18, %c0_19], %36 {strides = array<i32>} : memref<2x128xf32, #tpu.memory_space<vmem>>, vector<1x128xf32>,
      } else {
      }
      %c1_i32_8 = arith.constant 1 : i32
      %17 = arith.cmpi ne, %arg1, %c1_i32_8 : i32
      %18 = arith.extui %17 : i1 to i32
      %c0_i32_9 = arith.constant 0 : i32
      %19 = arith.cmpi ne, %18, %c0_i32_9 : i32
      scf.if %19 {
        %c0_10 = arith.constant 0 : index
        %c0_11 = arith.constant 0 : index
        %20 = vector.load %arg6[%c0_10, %c0_11] : memref<2x128xf32, #tpu.memory_space<vmem>>, vector<1x128xf32>
        %cst = arith.constant dense<0.000000e+00> : vector<128xf32>
        %21 = vector.multi_reduction <add>, %9, %cst [0] : vector<8x128xf32> to vector<128xf32>
        %22 = vector.shape_cast %21 : vector<128xf32> to vector<1x128xf32>
        %23 = arith.addf %20, %22 : vector<1x128xf32>
        %c0_12 = arith.constant 0 : index
        %c0_13 = arith.constant 0 : index
        %24 = vector.load %arg6[%c0_12, %c0_13] : memref<2x128xf32, #tpu.memory_space<vmem>>, vector<1x128xf32>
        tpu.vector_store %arg6[%c0_12, %c0_13], %23 {strides = array<i32>} : memref<2x128xf32, #tpu.memory_space<vmem>>, vector<1x128xf32>,
        %c1 = arith.constant 1 : index
        %c0_14 = arith.constant 0 : index
        %25 = vector.load %arg6[%c1, %c0_14] : memref<2x128xf32, #tpu.memory_space<vmem>>, vector<1x128xf32>
        %26 = arith.mulf %9, %9 : vector<8x128xf32>
        %cst_15 = arith.constant dense<0.000000e+00> : vector<128xf32>
        %27 = vector.multi_reduction <add>, %26, %cst_15 [0] : vector<8x128xf32> to vector<128xf32>
        %28 = vector.shape_cast %27 : vector<128xf32> to vector<1x128xf32>
        %29 = arith.addf %25, %28 : vector<1x128xf32>
        %c1_16 = arith.constant 1 : index
        %c0_17 = arith.constant 0 : index
        %30 = vector.load %arg6[%c1_16, %c0_17] : memref<2x128xf32, #tpu.memory_space<vmem>>, vector<1x128xf32>
        tpu.vector_store %arg6[%c1_16, %c0_17], %29 {strides = array<i32>} : memref<2x128xf32, #tpu.memory_space<vmem>>, vector<1x128xf32>,
      } else {
      }
    } else {
    }
    %c1_i32 = arith.constant 1 : i32
    %3 = arith.cmpi eq, %arg0, %c1_i32 : i32
    %4 = arith.extui %3 : i1 to i32
    %c0_i32_1 = arith.constant 0 : i32
    %5 = arith.cmpi ne, %4, %c0_i32_1 : i32
    scf.if %5 {
      %c0_i32_2 = arith.constant 0 : i32
      %6 = arith.cmpi eq, %arg1, %c0_i32_2 : i32
      %7 = arith.extui %6 : i1 to i32
      %c0_i32_3 = arith.constant 0 : i32
      %8 = arith.cmpi ne, %7, %c0_i32_3 : i32
      scf.if %8 {
        %c0_9 = arith.constant 0 : index
        %c0_10 = arith.constant 0 : index
        %20 = vector.load %arg6[%c0_9, %c0_10] : memref<2x128xf32, #tpu.memory_space<vmem>>, vector<1x128xf32>
        %c1_11 = arith.constant 1 : index
        %c0_12 = arith.constant 0 : index
        %21 = vector.load %arg6[%c1_11, %c0_12] : memref<2x128xf32, #tpu.memory_space<vmem>>, vector<1x128xf32>
        %c32_i32 = arith.constant 32 : i32
        %22 = tpu.dynamic_rotate %20 by %c32_i32 dim 1 : vector<1x128xf32>, i32 -> vector<1x128xf32>
        %23 = arith.addf %20, %22 : vector<1x128xf32>
        %c32_i32_13 = arith.constant 32 : i32
        %24 = tpu.dynamic_rotate %21 by %c32_i32_13 dim 1 : vector<1x128xf32>, i32 -> vector<1x128xf32>
        %25 = arith.addf %21, %24 : vector<1x128xf32>
        %c64_i32 = arith.constant 64 : i32
        %26 = tpu.dynamic_rotate %23 by %c64_i32 dim 1 : vector<1x128xf32>, i32 -> vector<1x128xf32>
        %27 = arith.addf %23, %26 : vector<1x128xf32>
        %c64_i32_14 = arith.constant 64 : i32
        %28 = tpu.dynamic_rotate %25 by %c64_i32_14 dim 1 : vector<1x128xf32>, i32 -> vector<1x128xf32>
        %29 = arith.addf %25, %28 : vector<1x128xf32>
        %cst = arith.constant 0.020833334 : f32
        %30 = vector.broadcast %cst : f32 to vector<1x128xf32>
        %31 = arith.mulf %27, %30 : vector<1x128xf32>
        %cst_15 = arith.constant 0.020833334 : f32
        %32 = vector.broadcast %cst_15 : f32 to vector<1x128xf32>
        %33 = arith.mulf %29, %32 : vector<1x128xf32>
        %34 = arith.mulf %31, %31 : vector<1x128xf32>
        %35 = arith.subf %33, %34 : vector<1x128xf32>
        %cst_16 = arith.constant 0.000000e+00 : f32
        %36 = vector.broadcast %cst_16 : f32 to vector<1x128xf32>
        %37 = arith.maximumf %35, %36 : vector<1x128xf32>
        %cst_17 = arith.constant 9.99999974E-6 : f32
        %38 = vector.broadcast %cst_17 : f32 to vector<1x128xf32>
        %39 = arith.addf %37, %38 : vector<1x128xf32>
        %40 = math.rsqrt %39 : vector<1x128xf32>
        %c0_18 = arith.constant 0 : index
        %c0_19 = arith.constant 0 : index
        %41 = vector.load %arg2[%c0_18, %c0_19] : memref<2x128xf32, #tpu.memory_space<vmem>>, vector<1x128xf32>
        %42 = arith.mulf %41, %40 : vector<1x128xf32>
        %c1_20 = arith.constant 1 : index
        %c0_21 = arith.constant 0 : index
        %43 = vector.load %arg2[%c1_20, %c0_21] : memref<2x128xf32, #tpu.memory_space<vmem>>, vector<1x128xf32>
        %44 = arith.mulf %31, %42 : vector<1x128xf32>
        %45 = arith.subf %43, %44 : vector<1x128xf32>
        %c0_22 = arith.constant 0 : index
        %c0_23 = arith.constant 0 : index
        %46 = vector.load %arg7[%c0_22, %c0_23] : memref<2x128xf32, #tpu.memory_space<vmem>>, vector<1x128xf32>
        tpu.vector_store %arg7[%c0_22, %c0_23], %42 {strides = array<i32>} : memref<2x128xf32, #tpu.memory_space<vmem>>, vector<1x128xf32>,
        %c1_24 = arith.constant 1 : index
        %c0_25 = arith.constant 0 : index
        %47 = vector.load %arg7[%c1_24, %c0_25] : memref<2x128xf32, #tpu.memory_space<vmem>>, vector<1x128xf32>
        tpu.vector_store %arg7[%c1_24, %c0_25], %45 {strides = array<i32>} : memref<2x128xf32, #tpu.memory_space<vmem>>, vector<1x128xf32>,
      } else {
      }
      %c8_i32 = arith.constant 8 : i32
      %9 = arith.muli %arg1, %c8_i32 : i32
      %10 = tpu.assume_multiple %9, 8 : i32
      %11 = arith.index_cast %10 : i32 to index
      %c0 = arith.constant 0 : index
      %12 = vector.load %arg5[%11, %c0] : memref<16x128xf32, #tpu.memory_space<vmem>>, vector<8x128xf32>
      %c0_4 = arith.constant 0 : index
      %c0_5 = arith.constant 0 : index
      %13 = vector.load %arg7[%c0_4, %c0_5] : memref<2x128xf32, #tpu.memory_space<vmem>>, vector<1x128xf32>
      %14 = vector.broadcast %13 : vector<1x128xf32> to vector<8x128xf32>
      %15 = arith.mulf %12, %14 : vector<8x128xf32>
      %c1 = arith.constant 1 : index
      %c0_6 = arith.constant 0 : index
      %16 = vector.load %arg7[%c1, %c0_6] : memref<2x128xf32, #tpu.memory_space<vmem>>, vector<1x128xf32>
      %17 = vector.broadcast %16 : vector<1x128xf32> to vector<8x128xf32>
      %18 = arith.addf %15, %17 : vector<8x128xf32>
      %c0_7 = arith.constant 0 : index
      %c0_8 = arith.constant 0 : index
      %19 = vector.load %arg4[%c0_7, %c0_8] : memref<8x128xf32, #tpu.memory_space<vmem>>, vector<8x128xf32>
      tpu.vector_store %arg4[%c0_7, %c0_8], %18 {strides = array<i32>} : memref<8x128xf32, #tpu.memory_space<vmem>>, vector<8x128xf32>,
    } else {
    }
    return
  }
  func.func @transform_0(%arg0: i32, %arg1: i32) -> (i32, i32) {
    %c0_i32 = arith.constant 0 : i32
    %c0_i32_0 = arith.constant 0 : i32
    %c0_i32_1 = arith.constant 0 : i32
    return %c0_i32, %c0_i32_0 : i32, i32
  }
  func.func @transform_1(%arg0: i32, %arg1: i32) -> (i32, i32) {
    %c1_i32 = arith.constant 1 : i32
    %0 = arith.subi %c1_i32, %arg0 : i32
    %1 = arith.muli %0, %arg1 : i32
    %c0_i32 = arith.constant 0 : i32
    %c0_i32_0 = arith.constant 0 : i32
    return %1, %c0_i32 : i32, i32
  }
  func.func @transform_2(%arg0: i32, %arg1: i32) -> (i32, i32) {
    %0 = arith.muli %arg0, %arg1 : i32
    %c0_i32 = arith.constant 0 : i32
    %c0_i32_0 = arith.constant 0 : i32
    return %0, %c0_i32 : i32, i32
  }
}

</mosaic_0001>

<bundles_post_ra>
// kernel: tpu_custom_call.1
= control target key start
LH: loop header
LB: loop body
LE: loop exit
PB: predicated region body
PF: predicated region fallthrough
CT: control target
= control target key end

     0   :  { %s993_s0 = inlined_call_operand.hbm [shape: f32[2,128], index: 0, kind: input, shape index: {}]   ;;  %s994_s1 = inlined_call_operand.hbm [shape: f32[12,128], index: 1, kind: input, shape index: {}]   ;;  %s995_s2 = inlined_call_operand.hbm [shape: f32[12,128], index: 2, kind: output, shape index: {}]  }
   0x1   :  { %1004 = sst [smem:[#allocation20_spill]] %s993_s0 }
   0x2   :  { %1005 = sst [smem:[#allocation21_spill]] %s995_s2 }
   0x3   :  { %7 = vsyncpa [#allocation6], 0 }
   0x4   :  { %8 = vsyncpa [#allocation9], 0 }
   0x5   :  { %10 = vsyncpa [#allocation9 + $0x1], 0 }
   0x6   :  { %11 = vsyncpa [#allocation7], 0 }
   0x7   :  { %13 = vsyncpa [#allocation7 + $0x1], 0  ;;  %s768_s9 = smov 0   ;;  %s770_s10 = smov 0  }
   0x8   :  { %s772_s11 = smov 0   ;;  %s774_s12 = smov 0  }
   0x9   :  { %s776_s13 = smov 0   ;;  %s778_s14 = smov 0  }
   0xa   :  { %s780_s15 = smov 0   ;;  %s782_s16 = smov 0  }
   0xb   :  { %s784_s17 = smov 0   ;;  %s786_s18 = smov 0  }
   0xc   :  { %s788_s19 = smov 0  }
   0xd LB: > { %1006 = sst [smem:[#allocation14_spill]] %s705_s9  ;;  %s424_s20 = sadd.s32 4294967295, %s745_s19   ;;  %s745_s19 = sphi %s788_s19, %s19_s19   ;;  %s741_s18 = sphi %s786_s18, %s1037_s18   ;;  %s737_s17 = sphi %s784_s17, %s1036_s17   ;;  %s733_s16 = sphi %s782_s16, %s1027_s16   ;;  %s729_s15 = sphi %s780_s15, %s1026_s15   ;;  %s725_s14 = sphi %s778_s14, %s1035_s14   ;;  %s721_s13 = sphi %s776_s13, %s1034_s13   ;;  %s717_s12 = sphi %s774_s12, %s1033_s12   ;;  %s713_s11 = sphi %s772_s11, %s1032_s11   ;;  %s709_s10 = sphi %s770_s10, %s1031_s10   ;;  %s705_s9 = sphi %s768_s9, %s1030_s9  }
   0xe   : > { %1007 = sst [smem:[#allocation15_spill]] %s737_s17  ;;  %s425_s21 = sadd.s32 4294967294, %s745_s19  }
   0xf   : > { %1008 = sst [smem:[#allocation16_spill]] %s741_s18  ;;  %p76_p0 = scmp.ne.s32.totalorder %s721_s13, %s717_s12 }
  0x10   : > { %p824_p1 = scmp.eq.s32.totalorder %s424_s20, 0  ;;  %p101_p2 = scmp.ne.s32.totalorder %s713_s11, %s709_s10 }
  0x11   : > { %p102_p4 = scmp.eq.s32.totalorder %s424_s20, 3  ;;  %p107_p5 = scmp.ne.s32.totalorder %s709_s10, %s705_s9 }
  0x12   : > { %p832_p3 = por %p824_p1, %p76_p0  ;;  %p108_p6 = scmp.eq.s32.totalorder %s425_s21, 3 }
  0x13   : > { %p838_p7 = por %p102_p4, %p101_p2  ;;  %p426_p8 = scmp.ge.s32.totalorder %s745_s19, 1 }
  0x14   : > { %p843_p9 = por %p108_p6, %p107_p5  ;;  %p115_p10 = scmp.lt.s32.totalorder %s745_s19, 5 }
  0x15   : > { %s1011_s24 = scalar_select %p838_p7, 1, 0 }
  0x16   : > { %s1012_s25 = scalar_select %p843_p9, 1, 0 }
  0x17   : > { %p848_p11 = pnand %p426_p8, %p115_p10  ;;  %s747_s27 = smov [#allocation5]  }
  0x18   : > { %1013 = sst [smem:[#allocation17_spill]] %s1012_s25  ;;  %s128_s28 = sshll.u32 %s747_s27, 4  ;;  %s129_s28 = int_to_ptr.vmem [resolvable:$true] %s128_s28 }
  0x19   : > { %p457_p12 = pneg %p848_p11  ;;  %s28_s30 = sadd.s32 1, %s737_s17 }
  0x1a   : > { %s578_s3 = scalar_lea.vmem %s129_s28, 32  ;;  %p586_p6 = scmp.lt.s32.totalorder %s129_s28, %s129_s28 }
  0x1b   : > { %p458_p13 = pnand %p457_p12, %p824_p1  ;;  %p579_p2 = scmp.ne.s32.totalorder %s129_s28, %s578_s3 }
  0x1c   : > { %p587_p8 = scmp.lt.s32.totalorder %s578_s3, %s578_s3 }
  0x1d   : > { %p569_p0 = pneg %p458_p13 }
  0x1e   : > { %p588_p10 = por %p587_p8, %p586_p6 }
  0x1f   : > { %p581_p4 = pnand %p579_p2, %p569_p0 }
  0x21   : > { %p582_p5 = pneg %p581_p4 }
  0x23   : > { %p589_p9 = pnand %p588_p10, %p582_p5 }
  0x25   : > { %592 = shalt.err (!%p589_p9)
}
  0x26   : > { %s1015_s0 = sld [smem:[#allocation20_spill]]  ;;  %p29_p12 = scmp.ge.s32.totalorder %s28_s30, 2 }
  0x27   : > { %s31_s6 = sadd.s32 1, %s741_s18  ;;  %s56_s7 = ssub.s32 1, %s741_s18 }
  0x28   : > { %s1039_s30 = smov (%p29_p12, %s28_s30), 0  ;;  %s1041_s6 = smov (!%p29_p12, %s31_s6), %s741_s18 }
  0x29   : > { %1016 = sst [smem:[#allocation18_spill]] %s1039_s30  ;;  %s57_s8 = smul.u32 %s737_s17, %s56_s7 }
  0x2a   : > { %s63_s12 = sadd.s32 1, %s725_s14  ;;  %p33_p9 = scmp.ge.s32.totalorder %s1041_s6, 2 }
  0x2b   : > { %p70_p0 = scmp.ne.s32.totalorder %s725_s14, %s721_s13  ;;  %p71_p2 = scmp.eq.s32.totalorder %s745_s19, 0 }
  0x2c   : > { %460 = dma.hbm_to_vmem [thread:$0]  (!%p458_p13), %s1015_s0, 32, %s129_s28, [#allocation6]  }
  0x2d   : > { %s86_s20 = smul.u32 %s737_s17, %s741_s18  ;;  %s1043_s6 = smov (%p33_p9, %s1041_s6), 0 }
  0x2e   : > { %1017 = sst [smem:[#allocation19_spill]] %s1043_s6  ;;  %p470_p13 = scmp.lt.s32.totalorder %s745_s19, 4 }
  0x2f   : > { %s139_s21 = sand.u32 1, %s725_s14   ;;  %s58_s27 = ssub.s32 1, %s1043_s6 }
  0x30   : > { %s87_s28 = smul.u32 %s1043_s6, %s1039_s30  ;;  %p881_p4 = por %p71_p2, %p70_p0 }
  0x31   : > { %s59_s3 = smul.u32 %s58_s27, %s1039_s30  ;;  %s429_s7 = sshll.u32 %s139_s21, 3 }
  0x32   : > { %s88_s5 = ssub.s32 %s86_s20, %s87_s28  ;;  %s1019_s0 = sadd.s32 1, %s713_s11 }
  0x33   : > { %s60_s29 = ssub.s32 %s57_s8, %s59_s3  ;;  %p89_p5 = scmp.eq.s32.totalorder %s88_s5, 0 }
  0x34   : > { %p61_p6 = scmp.eq.s32.totalorder %s60_s29, 0  ;;  %s430_s25 = sshll.u32 %s57_s8, 7 }
  0x35   : > { %s888_s18 = scalar_select %p89_p5, %s713_s11, %s1019_s0  }
  0x36   : > { %s891_s17 = scalar_select %p61_p6, %s725_s14, %s63_s12  }
  0x37   : > { %s143_s9 = scalar_lea.vmem [#allocation8], %s429_s7  ;;  %s150_s30 = scalar_lea.hbm %s994_s1, %s430_s25 }
  0x38   : > { %s152_s2 = sshll.u32 %s143_s9, 4  ;;  %p900_p8 = pnand %p470_p13, %p881_p4  ;;  %s153_s2 = int_to_ptr.vmem [resolvable:$true] %s152_s2 }
  0x39   : > { %s140_s29 = scalar_lea.sflag [#allocation9], %s139_s21  ;;  %s606_s0 = scalar_lea.vmem %s153_s2, 128 }
  0x3a   : > { %p595_p10 = pneg %p900_p8  ;;  %p607_p12 = scmp.ne.s32.totalorder %s153_s2, %s606_s0 }
  0x3b   : > { %s748_s9 = smov [#allocation8]  }
  0x3c   : > { %p609_p9 = pnand %p607_p12, %p595_p10  ;;  %s611_s8 = sshll.u32 %s748_s9, 4  ;;  %s612_s8 = int_to_ptr.vmem [resolvable:$false] %s611_s8 }
  0x3d   : > { %s613_s6 = scalar_lea.vmem %s612_s8, 256  ;;  %p614_p2 = scmp.lt.s32.totalorder %s153_s2, %s612_s8 }
  0x3e   : > { %p610_p0 = pneg %p609_p9  ;;  %p615_p5 = scmp.lt.s32.totalorder %s613_s6, %s606_s0 }
  0x40   : > { %p616_p6 = por %p615_p5, %p614_p2 }
  0x42   : > { %p617_p7 = pnand %p616_p6, %p610_p0 }
  0x44   : > { %620 = shalt.err (!%p617_p7)
}
  0x45   : > { %464 = dma.hbm_to_vmem [thread:$0]  (!%p900_p8), %s150_s30, 128, %s153_s2, %s140_s29  }
  0x46   : > { %161 = sbr.rel (%p848_p11) target bundleno = 464 (0x1d0), region = 28 }
  0x4b   : > { %692 = dma.done.wait (%p824_p1), [#allocation6], 32  }
  0x4c   : > { %694 = vsyncadd (%p824_p1), [#allocation6], 4294967264  ;;  %s167_s25 = sand.u32 1, %s721_s13  }
  0x4d   : > { %s433_s12 = sshll.u32 %s167_s25, 3  ;;  %s168_s21 = scalar_lea.sflag [#allocation9], %s167_s25 }
  0x4e   : > { %s171_s28 = scalar_lea.vmem [#allocation8], %s433_s12 }
  0x4f   : > { %696 = dma.done.wait (%p832_p3), %s168_s21, 128  }
  0x50   : > { %698 = vsyncadd (%p832_p3), %s168_s21, 4294967168  ;;  %s189_s2 = sand.u32 1, %s709_s10   ;;  %p435_p1 = scmp.ne.s32.totalorder %s733_s16, 0 }
  0x51   : > { %s922_s26 = sshll.u32 %s189_s2, 3  ;;  %p436_p7 = scmp.ne.s32.totalorder (!%p435_p1), %s729_s15, 0 }
  0x52   : > { %s191_s22 = scalar_lea.vmem [#allocation10], %s922_s26  ;;  %198 = sbr.rel (%p435_p1) target bundleno = 148 (0x94), region = 40 }
  0x57   : > { %202 = sbr.rel (%p436_p7) target bundleno = 94 (0x5e), region = 44 }
  0x5c   : > { %v749_v0 = vmov 0.0  }
  0x5d   : > { %203 = vst [vmem:[#allocation3] sm:$0x3] %v749_v0 }
  0x5e PF: > { %v204_v1 = vld [vmem:[%s171_s28] sm:$0xff]  ;;  %s437_s23 = sshll.u32 %s729_s15, 3  ;;  %p438_p3 = scmp.ne.s32.totalorder %s729_s15, 1 }
  0x5f   : > { %s206_s30 = scalar_lea.vmem [#allocation2], %s437_s23  ;;  %s212_s3 = ssub.s32 (!%p438_p3), 12, %s437_s23 }
  0x60   : > { %207 = vst [vmem:[%s206_s30] sm:$0xff] %v204_v1  ;;  %211 = sbr.rel (%p438_p3) target bundleno = 124 (0x7c), region = 48 }
  0x65   : > { %v213_v2 = vlaneseq  ;;  %v215_v3 = vstv %s212_s3  ;;  %v218_v16 = vld [vmem:[#allocation3] sm:$0x1]  ;;  %v227_v19 = vld [vmem:[#allocation3 + $0x1] sm:$0x1] }
  0x67   : > { %v214_v4 = vshrl.u32 %v213_v2, 7 }
  0x69   : > { %vm216_vm0 = vcmp.lt.s32.totalorder %v214_v4, %v215_v3 }
  0x6a   : > { %v217_v5 = vsel %vm216_vm0, %v204_v1, 0.0 }
  0x6b   : > { %v219_v6 = vrot.slane %v217_v5, 4  ;;  %v228_v7 = vmul.f32 %v217_v5, %v217_v5 }
  0x6d   : > { %v220_v8 = vadd.f32 %v219_v6, %v217_v5  ;;  %v229_v9 = vrot.slane %v228_v7, 4 }
  0x6f   : > { %v221_v10 = vrot.slane %v220_v8, 2  ;;  %v230_v11 = vadd.f32 %v229_v9, %v228_v7 }
  0x71   : > { %v222_v12 = vadd.f32 %v221_v10, %v220_v8  ;;  %v231_v13 = vrot.slane %v230_v11, 2 }
  0x73   : > { %v223_v14 = vrot.slane %v222_v12, 1  ;;  %v232_v15 = vadd.f32 %v231_v13, %v230_v11 }
  0x75   : > { %v224_v17 = vadd.f32 %v223_v14, %v222_v12  ;;  %v233_v18 = vrot.slane %v232_v15, 1 }
  0x77   : > { %v225_v20 = vadd.f32 %v224_v17, %v218_v16  ;;  %v234_v21 = vadd.f32 %v233_v18, %v232_v15 }
  0x79   : > { %226 = vst [vmem:[#allocation3] sm:$0x1] %v225_v20  ;;  %v235_v22 = vadd.f32 %v234_v21, %v227_v19 }
  0x7b   : > { %236 = vst [vmem:[#allocation3 + $0x1] sm:$0x1] %v235_v22 }
  0x7c PF: > { %p439_p11 = scmp.eq.s32.totalorder %s729_s15, 1 }
  0x7e   : > { %240 = sbr.rel (%p439_p11) target bundleno = 148 (0x94), region = 52 }
  0x83   : > { %v242_v23 = vrot.slane %v204_v1, 4  ;;  %v251_v24 = vmul.f32 %v204_v1, %v204_v1  ;;  %v241_v33 = vld [vmem:[#allocation3] sm:$0x1]  ;;  %v250_v36 = vld [vmem:[#allocation3 + $0x1] sm:$0x1] }
  0x85   : > { %v243_v25 = vadd.f32 %v242_v23, %v204_v1  ;;  %v252_v26 = vrot.slane %v251_v24, 4 }
  0x87   : > { %v244_v27 = vrot.slane %v243_v25, 2  ;;  %v253_v28 = vadd.f32 %v252_v26, %v251_v24 }
  0x89   : > { %v245_v29 = vadd.f32 %v244_v27, %v243_v25  ;;  %v254_v30 = vrot.slane %v253_v28, 2 }
  0x8b   : > { %v246_v31 = vrot.slane %v245_v29, 1  ;;  %v255_v32 = vadd.f32 %v254_v30, %v253_v28 }
  0x8d   : > { %v247_v34 = vadd.f32 %v246_v31, %v245_v29  ;;  %v256_v35 = vrot.slane %v255_v32, 1 }
  0x8f   : > { %v248_v37 = vadd.f32 %v247_v34, %v241_v33  ;;  %v257_v38 = vadd.f32 %v256_v35, %v255_v32 }
  0x91   : > { %249 = vst [vmem:[#allocation3] sm:$0x1] %v248_v37  ;;  %v258_v39 = vadd.f32 %v257_v38, %v250_v36 }
  0x93   : > { %259 = vst [vmem:[#allocation3 + $0x1] sm:$0x1] %v258_v39 }
  0x94 PF: > { %p440_p13 = scmp.ne.s32.totalorder %s733_s16, 1 }
  0x95   : > { %p441_p4 = scmp.ne.s32.totalorder (!%p440_p13), %s729_s15, 0 }
  0x96   : > { %263 = sbr.rel (%p440_p13) target bundleno = 438 (0x1b6), region = 56 }
  0x9b   : > { %267 = sbr.rel (%p441_p4) target bundleno = 428 (0x1ac), region = 60  ;;  %s750_s4 = smov (!%p441_p4), 32  }
  0x9c   : > { %s751_s5 = smov (!%p441_p4), 64  }
  0xa0   : > { %v268_v40 = vld [vmem:[#allocation3] sm:$0x1]  ;;  %v269_v41 = vld [vmem:[#allocation3 + $0x1] sm:$0x1]  ;;  %v289_v56 = vld [vmem:[#allocation5] sm:$0x1] }
  0xa1   : > { %270 = vrot.lane.b32.xlu0 %v268_v40, %s750_s4  ;;  %v291_v59 = vld [vmem:[#allocation5 + $0x1] sm:$0x1] }
  0xa5   : > { %273 = vrot.lane.b32.xlu0 %v269_v41, %s750_s4 }
 0x113   : > { %v271_v42 = vpop.permute.xlu0 %270 }
 0x114   : > { %v272_v43 = vadd.f32 %v271_v42, %v268_v40 }
 0x116   : > { %276 = vrot.lane.b32.xlu1 %v272_v43, %s751_s5 }
 0x117   : > { %v274_v44 = vpop.permute.xlu0 %273 }
 0x118   : > { %v275_v45 = vadd.f32 %v274_v44, %v269_v41 }
 0x11a   : > { %279 = vrot.lane.b32.xlu1 %v275_v45, %s751_s5 }
 0x188   : > { %v277_v46 = vpop.permute.xlu1 %276 }
 0x189   : > { %v278_v47 = vadd.f32 %v277_v46, %v272_v43 }
 0x18b   : > { %v282_v48 = vmul.f32 0.020833334, %v278_v47 }
 0x18c   : > { %v280_v49 = vpop.permute.xlu1 %279 }
 0x18d   : > { %v281_v50 = vadd.f32 %v280_v49, %v275_v45  ;;  %v284_v51 = vmul.f32 %v282_v48, %v282_v48 }
 0x18f   : > { %v283_v52 = vmul.f32 0.020833334, %v281_v50 }
 0x191   : > { %v285_v53 = vsub.f32 %v283_v52, %v284_v51 }
 0x193   : > { %v286_v54 = vmax.f32 %v285_v53, 0.0 }
 0x195   : > { %v287_v55 = vadd.f32 1e-05, %v286_v54 }
 0x197   : > { %565 = vrsqrt.f32 %v287_v55 }
 0x1a4   : > { %v566_v57 = vpop.eup %565 }
 0x1a5   : > { %v290_v58 = vmul.f32 %v566_v57, %v289_v56 }
 0x1a7   : > { %v292_v60 = vmul.f32 %v290_v58, %v282_v48  ;;  %294 = vst [vmem:[#allocation4] sm:$0x1] %v290_v58 }
 0x1a9   : > { %v293_v61 = vsub.f32 %v291_v59, %v292_v60 }
 0x1ab   : > { %295 = vst [vmem:[#allocation4 + $0x1] sm:$0x1] %v293_v61 }
 0x1ac PF: > { %s442_s7 = sshll.u32 %s729_s15, 3 }
 0x1ad   : > { %s297_s27 = scalar_lea.vmem [#allocation2], %s442_s7 }
 0x1ae   : > { %v443_v62 = vld [vmem:[#allocation4] ss:$0 sm:$0xff]  ;;  %v298_v63 = vld [vmem:[%s297_s27] sm:$0xff] }
 0x1af   : > { %v304_v1 = vmul.f32 %v443_v62, %v298_v63 }
 0x1b2   : > { %v444_v0 = vld [vmem:[#allocation4 + $0x1] ss:$0 sm:$0xff] }
 0x1b3   : > { %v310_v2 = vadd.f32 %v444_v0, %v304_v1 }
 0x1b5   : > { %311 = vst [vmem:[%s191_s22] sm:$0xff] %v310_v2 }
 0x1b6 PF: > { %s320_s20 = smul.u32 %s729_s15, %s733_s16  ;;  %s327_s29 = sshll.u32 %s191_s22, 4  ;;  %s328_s29 = int_to_ptr.vmem [resolvable:$true] %s327_s29 }
 0x1b7   : > { %s1021_s6 = sld [smem:[#allocation21_spill]]  ;;  %s313_s12 = scalar_lea.sflag [#allocation7], %s189_s2 }
 0x1b8   : > { %s446_s0 = sshll.u32 %s320_s20, 7  ;;  %s621_s21 = scalar_lea.vmem %s328_s29, 128 }
 0x1b9   : > { %p622_p8 = scmp.ne.s32.totalorder %s328_s29, %s621_s21  ;;  %p1022_p10 = scmp.ne.s32.totalorder %s1011_s24, 0 }
 0x1ba   : > { %s752_s28 = smov [#allocation10]  }
 0x1bb   : > { %p623_p12 = pnand %p622_p8, %p1022_p10  ;;  %s625_s23 = sshll.u32 %s752_s28, 4  ;;  %s626_s23 = int_to_ptr.vmem [resolvable:$false] %s625_s23 }
 0x1bc   : > { %s627_s30 = scalar_lea.vmem %s626_s23, 256  ;;  %p628_p0 = scmp.lt.s32.totalorder %s328_s29, %s626_s23 }
 0x1bd   : > { %s325_s25 = scalar_lea.hbm %s1021_s6, %s446_s0  ;;  %p624_p9 = pneg %p623_p12 }
 0x1be   : > { %p629_p2 = scmp.lt.s32.totalorder %s627_s30, %s621_s21 }
 0x1c0   : > { %p630_p5 = por %p629_p2, %p628_p0 }
 0x1c2   : > { %p631_p6 = pnand %p630_p5, %p624_p9 }
 0x1c4   : > { %634 = shalt.err (!%p631_p6)
}
 0x1c5   : > { %s635_s15 = scalar_lea.hbm %s325_s25, 128  ;;  %s639_s26 = scalar_lea.hbm %s1021_s6, 256 }
 0x1c6   : > { %p636_p1 = scmp.ne.s32.totalorder %s325_s25, %s635_s15  ;;  %p640_p11 = scmp.lt.s32.totalorder %s325_s25, %s1021_s6 }
 0x1c7   : > { %p641_p13 = scmp.lt.s32.totalorder %s639_s26, %s635_s15 }
 0x1c8   : > { %p637_p7 = pnand %p636_p1, %p1022_p10 }
 0x1c9   : > { %p642_p4 = por %p641_p13, %p640_p11 }
 0x1ca   : > { %p638_p3 = pneg %p637_p7 }
 0x1cc   : > { %p643_p8 = pnand %p642_p4, %p638_p3 }
 0x1ce   : > { %646 = shalt.err (!%p643_p8)
}
 0x1cf   : > { %455 = dma.vmem_to_hbm [thread:$0]  (%p1022_p10), %s328_s29, 128, %s325_s25, %s313_s12  }
 0x1d0 PF: > { %s1023_s4 = sld [smem:[#allocation14_spill]]  ;;  %p472_p12 = scmp.ge.s32.totalorder %s745_s19, 2 }
 0x1d1   : > { %s1024_s5 = sld [smem:[#allocation17_spill]] }
 0x1d6   : > { %s339_s7 = sand.u32 1, %s1023_s4  }
 0x1d7   : > { %p1025_p9 = scmp.ne.s32.totalorder %s1024_s5, 0  ;;  %s340_s27 = scalar_lea.sflag [#allocation7], %s339_s7 }
 0x1d9   : > { %p466_p0 = pnand %p472_p12, %p1025_p9 }
 0x1db   : > { %p467_p2 = pneg %p466_p0 }
 0x1dd   : > { %700 = dma.done.wait (%p467_p2), %s340_s27, 128  }
 0x1de   : > { %702 = vsyncadd (%p467_p2), %s340_s27, 4294967168  ;;  %s19_s19 = sadd.s32 1, %s745_s19   ;;  %s1026_s15 = sld [smem:[#allocation15_spill]] }
 0x1df   : > { %p16_p5 = scmp.ge.s32.totalorder %s19_s19, 6   ;;  %s1027_s16 = sld [smem:[#allocation16_spill]] }
 0x1e0   : > { %s1028_s24 = sld [smem:[#allocation18_spill]]  ;;  %s1030_s9 = smov %s709_s10 }
 0x1e1   : > { %s1029_s20 = sld [smem:[#allocation19_spill]]  ;;  %s1031_s10 = smov %s713_s11 }
 0x1e2   : > { %s1032_s11 = smov %s888_s18  ;;  %s1033_s12 = smov %s721_s13 }
 0x1e3   : > { %s1034_s13 = smov %s725_s14  ;;  %s1035_s14 = smov %s891_s17 }
 0x1e4   :  { %18 = sbr.rel (!%p16_p5) target bundleno = 13 (0xd), region = 104 }
 0x1e6   : > { %s1036_s17 = smov %s1028_s24 }
 0x1e7   : > { %s1037_s18 = smov %s1029_s20 }
 0x1e9   :  { %345 = vsyncpa [#allocation6], 1 }
 0x1ea   :  { %347 = vsyncpa [#allocation6 + $0x1], 1 }
 0x1eb   :  { %348 = vsyncpa [#allocation9], 1 }
 0x1ec   :  { %350 = vsyncpa [#allocation9 + $0x1], 1 }
 0x1ed   :  { %351 = vsyncpa [#allocation7], 1 }
 0x1ee   :  { %353 = vsyncpa [#allocation7 + $0x1], 1 }

</bundles_post_ra>
